<compile_context>
chip_gen: v5e
topology: v5e:2x2
jax: 0.10.0
libtpu: 0.0.40
codegen_flags: <defaults>
</compile_context>

<pallas_src>
import functools

import jax
import jax.numpy as jnp
from jax import lax
from jax.experimental import pallas as pl
from jax.experimental.pallas import tpu as pltpu

EPS = 1e-5
LANE = 128            # output channels padded to the TPU lane width
DEFAULT_TILE_M = 128  # row tile for the im2col fallback matmul (256-512 on v6e/v7x)
EW_ROW_CAP = 1024     # elementwise kernels use the largest row tile <= this

_PARALLEL = pltpu.CompilerParams(dimension_semantics=("parallel",))
# TODO(synk): per-target tuning -- set vmem_limit_bytes explicitly and put
# pipeline_mode=pl.Buffered(1) on the grid-invariant weight blocks for v7x's
# 64 MiB (32 MiB scoped) VMEM; widen conv output blocks toward 256 on v6e/v7x.


def _round_up(n, m):
    return (n + m - 1) // m * m


def _pick_row_tile(rows, cap=EW_ROW_CAP):
    """Largest multiple of 8 <= cap dividing `rows` (rows is a multiple of 8).
    Elementwise kernels are pure HBM-roofline work: big row tiles amortize the
    ~0.35us per-grid-step overhead (29% -> 85% of roofline from 128 -> 512)."""
    assert rows % 8 == 0
    t = min(rows, cap)
    t -= t % 8
    while rows % t:
        t -= 8
    return t


# ----------------------------- Pallas kernels ------------------------------

def _conv3x3_s1_stats_kernel(x_ref, w_ref, z_ref, s_ref, *, ho, wo, cin):
    """One image of a 3x3 / stride-1 / pad-1 conv with im2col done *in VMEM*:
    9 shifted (Ho*Wo, Cin) x (Cin, Cp) dots accumulated in f32 on the MXU,
    plus per-image BN partial statistics (sum, sum of squares)."""
    img = x_ref[0].astype(jnp.float32)           # (Ho+2, Wo+2, Cin)
    hw = ho * wo
    cp = z_ref.shape[-1]
    acc = jnp.zeros((hw, cp), jnp.float32)
    for t in range(9):
        kh, kw = divmod(t, 3)
        patch = img[kh:kh + ho, kw:kw + wo, :].reshape(hw, cin)
        acc = acc + jnp.dot(patch.astype(jnp.bfloat16), w_ref[t],
                            preferred_element_type=jnp.float32)
    z_ref[...] = acc
    zsum = jnp.sum(acc, axis=0, keepdims=True)          # (1, Cp)
    zsq = jnp.sum(acc * acc, axis=0, keepdims=True)     # (1, Cp)
    s_ref[0] = jnp.concatenate([zsum, zsq], axis=0)     # (2, Cp)


def _matmul_stats_kernel(p_ref, w_ref, z_ref, s_ref):
    """Fallback (strided conv via host im2col): z = patches @ W.  No bias (a
    conv bias followed by train-mode BN cancels exactly), so zero-padded grid
    rows contribute exact zeros to the stats and no row mask is needed."""
    z = jnp.dot(p_ref[...], w_ref[...], preferred_element_type=jnp.float32)
    z_ref[...] = z
    zsum = jnp.sum(z, axis=0, keepdims=True)
    zsq = jnp.sum(z * z, axis=0, keepdims=True)
    s_ref[0] = jnp.concatenate([zsum, zsq], axis=0)


def _bn_relu_kernel(z_ref, a_ref, b_ref, o_ref):
    """y = relu(a*z + b); BN folded into per-channel scale/shift (a, b)."""
    o_ref[...] = jnp.maximum(z_ref[...] * a_ref[...] + b_ref[...],
                             0.0).astype(o_ref.dtype)


def _bn_conv_shortcut_relu_kernel(z_ref, a_ref, b_ref, xs_ref, w3_ref, b3_ref,
                                  o_ref):
    """out = relu(a*z + b + (xs @ W3 + b3)) -- strided 1x1-conv shortcut."""
    sc = jnp.dot(xs_ref[...], w3_ref[...],
                 preferred_element_type=jnp.float32) + b3_ref[...]
    o_ref[...] = jnp.maximum(z_ref[...] * a_ref[...] + b_ref[...] + sc, 0.0)


def _bn_identity_shortcut_relu_kernel(z_ref, a_ref, b_ref, sx_ref, o_ref):
    """out = relu(a*z + b + x) -- identity shortcut (plain VPU add)."""
    o_ref[...] = jnp.maximum(
        z_ref[...] * a_ref[...] + b_ref[...] + sx_ref[...], 0.0)


# ------------------------------- wrappers -----------------------------------

def _row_spec(tile_m, width):
    return pl.BlockSpec((tile_m, width), lambda i: (i, 0))


def _bcast_spec(shape):
    return pl.BlockSpec(shape, lambda i: (0,) * len(shape))


def _conv3x3_s1_stats(x_img, w_hwio, cp):
    """In-kernel-im2col conv: x_img (N,Ho,Wo,Cin) un-padded activation.
    Returns z (N*Ho*Wo, cp) f32 and per-image stats (N, 2, cp)."""
    N, Ho, Wo, Cin = x_img.shape
    xp = jnp.pad(x_img, ((0, 0), (1, 1), (1, 1), (0, 0))).astype(jnp.bfloat16)
    w = _pad_last(w_hwio, cp).reshape(9, Cin, cp).astype(jnp.bfloat16)
    hw = Ho * Wo
    kernel = functools.partial(_conv3x3_s1_stats_kernel, ho=Ho, wo=Wo, cin=Cin)
    return pl.pallas_call(
        kernel,
        out_shape=(jax.ShapeDtypeStruct((N * hw, cp), jnp.float32),
                   jax.ShapeDtypeStruct((N, 2, cp), jnp.float32)),
        grid=(N,),
        in_specs=[pl.BlockSpec((1, Ho + 2, Wo + 2, Cin),
                               lambda n: (n, 0, 0, 0)),
                  _bcast_spec((9, Cin, cp))],
        out_specs=(pl.BlockSpec((hw, cp), lambda n: (n, 0)),
                   pl.BlockSpec((1, 2, cp), lambda n: (n, 0, 0))),
        compiler_params=_PARALLEL,
    )(xp, w)


def _matmul_stats(patches, wmat, tile_m):
    mp, k = patches.shape
    cp = wmat.shape[1]
    nt = mp // tile_m
    return pl.pallas_call(
        _matmul_stats_kernel,
        out_shape=(jax.ShapeDtypeStruct((mp, cp), jnp.float32),
                   jax.ShapeDtypeStruct((nt, 2, cp), jnp.float32)),
        grid=(nt,),
        in_specs=[_row_spec(tile_m, k), _bcast_spec((k, cp))],
        out_specs=(_row_spec(tile_m, cp),
                   pl.BlockSpec((1, 2, cp), lambda i: (i, 0, 0))),
        compiler_params=_PARALLEL,
    )(patches, wmat)


def _conv3x3(x_img, w_hwio, cp, stride, tile_m):
    """3x3 pad-1 conv + BN partial stats; picks the in-kernel-im2col path for
    stride 1 (falling back to host-side im2col if Mosaic rejects the tiling)."""
    N, H, W, Cin = x_img.shape
    Ho = (H - 1) // stride + 1
    Wo = (W - 1) // stride + 1
    M = N * Ho * Wo
    if stride == 1 and Wo % 8 == 0:
        try:
            z, st = _conv3x3_s1_stats(x_img, w_hwio, cp)
            return z, st, M, Ho, Wo
        except Exception:
            pass  # lowering gap on this TPU generation -> host-side im2col
    p = _im2col(x_img, 3, stride, 1).reshape(M, 9 * Cin)
    rows = _round_up(M, tile_m)
    p = _pad_rows(p, rows).astype(jnp.bfloat16)
    wmat = _pad_last(w_hwio.reshape(9 * Cin, -1), cp).astype(jnp.bfloat16)
    z, st = _matmul_stats(p, wmat, tile_m)
    return z, st, M, Ho, Wo


def _bn_relu(z, a, b, out_dtype):
    mp, cp = z.shape
    t = _pick_row_tile(mp)
    return pl.pallas_call(
        _bn_relu_kernel,
        out_shape=jax.ShapeDtypeStruct((mp, cp), out_dtype),
        grid=(mp // t,),
        in_specs=[_row_spec(t, cp), _bcast_spec((1, cp)), _bcast_spec((1, cp))],
        out_specs=_row_spec(t, cp),
        compiler_params=_PARALLEL,
    )(z, a, b)


def _bn_conv_shortcut_relu(z, a, b, xs, w3, b3):
    mp, cp = z.shape
    cin_p = xs.shape[1]
    t = _pick_row_tile(mp)
    return pl.pallas_call(
        _bn_conv_shortcut_relu_kernel,
        out_shape=jax.ShapeDtypeStruct((mp, cp), jnp.float32),
        grid=(mp // t,),
        in_specs=[_row_spec(t, cp), _bcast_spec((1, cp)), _bcast_spec((1, cp)),
                  _row_spec(t, cin_p), _bcast_spec((cin_p, cp)),
                  _bcast_spec((1, cp))],
        out_specs=_row_spec(t, cp),
        compiler_params=_PARALLEL,
    )(z, a, b, xs, w3, b3)


def _bn_identity_shortcut_relu(z, a, b, sx):
    mp, cp = z.shape
    t = _pick_row_tile(mp)
    return pl.pallas_call(
        _bn_identity_shortcut_relu_kernel,
        out_shape=jax.ShapeDtypeStruct((mp, cp), jnp.float32),
        grid=(mp // t,),
        in_specs=[_row_spec(t, cp), _bcast_spec((1, cp)), _bcast_spec((1, cp)),
                  _row_spec(t, cp)],
        out_specs=_row_spec(t, cp),
        compiler_params=_PARALLEL,
    )(z, a, b, sx)


def _bn_fold(stats, m_real, gamma, beta):
    """Fold global batch statistics into per-channel scale/shift:
    a = gamma / sqrt(var + eps), b = beta - a * mu (biased var, train mode)."""
    zsum = jnp.sum(stats[:, 0, :], axis=0)
    zsq = jnp.sum(stats[:, 1, :], axis=0)
    mu = zsum / m_real
    # TODO(synk): E[z^2]-E[z]^2 can cancel catastrophically when |mean| >> std
    # at large M; switch to centered per-tile partials + Chan's formula then.
    var = jnp.maximum(zsq / m_real - mu * mu, 0.0)
    a = gamma * lax.rsqrt(var + EPS)
    b = beta - a * mu
    return a.reshape(1, -1), b.reshape(1, -1)


# --------------------------- host-side data movement -------------------------

def _im2col(x, k, stride, pad):
    """x: (N,H,W,C) -> (N,Ho,Wo,k*k*C); column order (kh,kw,c) matches the
    (kh,kw,Cin,Cout) -> (kh*kw*Cin,Cout) weight reshape.  Only used for the
    strided conv fallback; stride-1 convs do im2col inside the kernel."""
    N, H, W, C = x.shape
    xp = jnp.pad(x, ((0, 0), (pad, pad), (pad, pad), (0, 0)))
    Ho = (H + 2 * pad - k) // stride + 1
    Wo = (W + 2 * pad - k) // stride + 1
    cols = []
    for kh in range(k):
        for kw in range(k):
            cols.append(xp[:, kh:kh + stride * Ho:stride,
                           kw:kw + stride * Wo:stride, :])
    return jnp.concatenate(cols, axis=-1)


def _pad_last(a, width):
    pad = width - a.shape[-1]
    return a if pad == 0 else jnp.pad(a, [(0, 0)] * (a.ndim - 1) + [(0, pad)])


def _pad_rows(a, rows):
    pad = rows - a.shape[0]
    return a if pad == 0 else jnp.pad(a, [(0, pad)] + [(0, 0)] * (a.ndim - 1))


def residual_forward(x_nchw, params, *, stride, use_1x1conv,
                     tile_m=DEFAULT_TILE_M):
    assert tile_m > 0 and tile_m % 8 == 0
    x = jnp.transpose(x_nchw, (0, 2, 3, 1)).astype(jnp.float32)  # NCHW -> NHWC
    N, H, W, Cin = x.shape
    Cout = params["w1"].shape[-1]
    Cp = _round_up(Cout, LANE)          # lane-dense output channel width

    # ---- conv1 (3x3, stride s, pad 1) + BN1 + ReLU ----
    # Conv bias is dropped: train-mode BN absorbs it exactly.
    z1, st1, M, Ho, Wo = _conv3x3(x, params["w1"], Cp, stride, tile_m)
    a1, sh1 = _bn_fold(st1, M, _pad_last(params["g1"], Cp),
                       _pad_last(params["beta1"], Cp))
    y1 = _bn_relu(z1, a1, sh1, jnp.bfloat16)          # bf16 writeback

    # ---- conv2 (3x3, stride 1, pad 1) + BN2 ----
    # Slice back to the real channel width so conv2 never reads lane padding.
    y1_img = y1[:M, :Cout].reshape(N, Ho, Wo, Cout)
    z2, st2, _, _, _ = _conv3x3(y1_img, params["w2"], Cp, 1, tile_m)
    a2, sh2 = _bn_fold(st2, M, _pad_last(params["g2"], Cp),
                       _pad_last(params["beta2"], Cp))
    rows2 = z2.shape[0]

    # ---- shortcut + add + ReLU ----
    xs = x[:, ::stride, ::stride, :].reshape(M, Cin)
    if use_1x1conv:
        Cin_p = _round_up(Cin, LANE)
        xs = _pad_rows(_pad_last(xs, Cin_p), rows2).astype(jnp.bfloat16)
        w3 = jnp.pad(params["w3"].reshape(Cin, Cout),
                     ((0, Cin_p - Cin), (0, Cp - Cout))).astype(jnp.bfloat16)
        b3 = _pad_last(params["b3"], Cp).reshape(1, Cp)
        out = _bn_conv_shortcut_relu(z2, a2, sh2, xs, w3, b3)
    else:
        assert Cin == Cout, "identity shortcut needs Cin == Cout"
        sx = _pad_rows(_pad_last(xs, Cp), rows2)      # f32 identity add
        out = _bn_identity_shortcut_relu(z2, a2, sh2, sx)

    out = out[:M, :Cout].reshape(N, Ho, Wo, Cout)
    return jnp.transpose(out, (0, 3, 1, 2))           # NHWC -> NCHW


# --------------------------- pure-JAX references -----------------------------

def _ref_residual(x, params, *, stride, use_1x1conv, conv_dtype=jnp.bfloat16):
    """Reference model.  conv_dtype=bf16 mirrors the kernel's MXU precision
    policy (bf16 operands, f32 accumulation) for a tight comparison;
    conv_dtype=f32 is the strict full-precision module (loose sanity check).
    The reference keeps the conv biases b1/b2: train-mode BN cancels them."""
    def conv(inp, w_hwio, b, s, pad):
        w = jnp.transpose(w_hwio, (3, 2, 0, 1))       # HWIO -> OIHW
        y = lax.conv_general_dilated(
            inp.astype(conv_dtype), w.astype(conv_dtype), (s, s),
            ((pad, pad), (pad, pad)),
            dimension_numbers=("NCHW", "OIHW", "NCHW"),
            preferred_element_type=jnp.float32,
            precision=lax.Precision.HIGHEST)
        return y + b[None, :, None, None]

    def bn(y, g, bt):
        mu = jnp.mean(y, axis=(0, 2, 3), keepdims=True)
        var = jnp.mean((y - mu) ** 2, axis=(0, 2, 3), keepdims=True)
        return ((y - mu) * lax.rsqrt(var + EPS)
                * g[None, :, None, None] + bt[None, :, None, None])

    y = jax.nn.relu(bn(conv(x, params["w1"], params["b1"], stride, 1),
                       params["g1"], params["beta1"]))
    y = bn(conv(y, params["w2"], params["b2"], 1, 1),
           params["g2"], params["beta2"])
    sx = conv(x, params["w3"], params["b3"], stride, 0) if use_1x1conv else x
    return jax.nn.relu(y + sx)


# --------------------------------- main --------------------------------------

def _init_params(key, cin, cout, use_1x1conv):
    ks = jax.random.split(key, 6)
    p = {
        "w1": 0.1 * jax.random.normal(ks[0], (3, 3, cin, cout), jnp.float32),
        "b1": 0.1 * jax.random.normal(ks[1], (cout,), jnp.float32),
        "w2": 0.1 * jax.random.normal(ks[2], (3, 3, cout, cout), jnp.float32),
        "b2": 0.1 * jax.random.normal(ks[3], (cout,), jnp.float32),
        "g1": jnp.ones((cout,), jnp.float32),
        "beta1": jnp.zeros((cout,), jnp.float32),
        "g2": jnp.ones((cout,), jnp.float32),
        "beta2": jnp.zeros((cout,), jnp.float32),
    }
    if use_1x1conv:
        p["w3"] = 0.1 * jax.random.normal(ks[4], (1, 1, cin, cout), jnp.float32)
        p["b3"] = 0.1 * jax.random.normal(ks[5], (cout,), jnp.float32)
    return p


def _check(name, x, params, *, stride, use_1x1conv):
    out = residual_forward(x, params, stride=stride, use_1x1conv=use_1x1conv)
    out = jax.block_until_ready(out)
    # Tight check vs a reference with the same precision policy (bf16 matmul
    # operands, f32 accumulation): only summation-order noise remains.
    ref_bf16 = _ref_residual(x, params, stride=stride,
                             use_1x1conv=use_1x1conv, conv_dtype=jnp.bfloat16)
    assert jnp.allclose(out, ref_bf16, atol=2e-3, rtol=2e-3), name
    # Loose sanity check vs the strict f32 module; the gap is bf16 operand
    # rounding in the MXU inputs only.
    ref_f32 = _ref_residual(x, params, stride=stride,
                            use_1x1conv=use_1x1conv, conv_dtype=jnp.float32)
    assert jnp.allclose(out, ref_f32, atol=5e-2, rtol=5e-2), name
    return out


if __name__ == "__main__":
    key = jax.random.PRNGKey(0)
    kx, kp1, kp2 = jax.random.split(key, 3)
    x = jax.random.normal(kx, (2, 4, 16, 16), jnp.float32)  # NCHW, like PyTorch

    # Config A: downsampling block (use_1x1conv=True, stride=2).
    # conv1 exercises the strided im2col fallback, conv2 the in-kernel im2col.
    params_a = _init_params(kp1, 4, 8, use_1x1conv=True)
    out_a = _check("config_a", x, params_a, stride=2, use_1x1conv=True)
    assert out_a.shape == (2, 8, 8, 8)

    # Config B: identity-shortcut block (stride=1). Both convs run the
    # in-kernel-im2col path with a 2-image grid (>= 2 tiles for v7x megacore).
    params_b = _init_params(kp2, 4, 4, use_1x1conv=False)
    out_b = _check("config_b", x, params_b, stride=1, use_1x1conv=False)
    assert out_b.shape == (2, 4, 16, 16)

    print("KERNEL_OK")
</pallas_src>

<mosaic_0001>
module attributes {stable_mosaic.version = 11 : i64} {
  func.func @_matmul_stats_kernel(%arg0: i32, %arg1: memref<128x36xbf16, #tpu.memory_space<vmem>>, %arg2: memref<36x128xbf16, #tpu.memory_space<vmem>>, %arg3: memref<128x128xf32, #tpu.memory_space<vmem>>, %arg4: memref<1x2x128xf32, #tpu.memory_space<vmem>>) attributes {dimension_semantics = [#tpu.dimension_semantics<parallel>], iteration_bounds = array<i64: 1>, scalar_prefetch = 0 : i64, scratch_operands = 0 : i64, tpu.core_type = #tpu.core_type<tc>, window_params = [{transform_indices = @transform_0, window_bounds = array<i64: 128, 36>}, {pipeline_mode = #tpu.pipeline_mode<synchronous>, transform_indices = @transform_1, window_bounds = array<i64: 36, 128>}, {transform_indices = @transform_2, window_bounds = array<i64: 128, 128>}, {transform_indices = @transform_3, window_bounds = array<i64: 1, 2, 128>}]} {
    %c0 = arith.constant 0 : index
    %c0_0 = arith.constant 0 : index
    %0 = vector.load %arg1[%c0, %c0_0] : memref<128x36xbf16, #tpu.memory_space<vmem>>, vector<128x36xbf16>
    %c0_1 = arith.constant 0 : index
    %c0_2 = arith.constant 0 : index
    %1 = vector.load %arg2[%c0_1, %c0_2] : memref<36x128xbf16, #tpu.memory_space<vmem>>, vector<36x128xbf16>
    %cst = arith.constant dense<0.000000e+00> : vector<128x128xf32>
    %2 = tpu.matmul %0, %1, %cst {dimension_numbers = #tpu.dot_dimension_numbers<[1], [0], [0], [1], [0, 0, 1, 1], [], []>} : vector<128x36xbf16>, vector<36x128xbf16>, vector<128x128xf32> -> vector<128x128xf32>
    %c0_3 = arith.constant 0 : index
    %c0_4 = arith.constant 0 : index
    %3 = vector.load %arg3[%c0_3, %c0_4] : memref<128x128xf32, #tpu.memory_space<vmem>>, vector<128x128xf32>
    tpu.vector_store %arg3[%c0_3, %c0_4], %2 {strides = array<i32>} : memref<128x128xf32, #tpu.memory_space<vmem>>, vector<128x128xf32>,
    %cst_5 = arith.constant dense<0.000000e+00> : vector<128xf32>
    %4 = vector.multi_reduction <add>, %2, %cst_5 [0] : vector<128x128xf32> to vector<128xf32>
    %5 = vector.shape_cast %4 : vector<128xf32> to vector<1x128xf32>
    %6 = arith.mulf %2, %2 : vector<128x128xf32>
    %cst_6 = arith.constant dense<0.000000e+00> : vector<128xf32>
    %7 = vector.multi_reduction <add>, %6, %cst_6 [0] : vector<128x128xf32> to vector<128xf32>
    %8 = vector.shape_cast %7 : vector<128xf32> to vector<1x128xf32>
    %9 = tpu.concatenate %5, %8 in 0 : vector<1x128xf32>, vector<1x128xf32> -> vector<2x128xf32>
    %c0_7 = arith.constant 0 : index
    %c0_8 = arith.constant 0 : index
    %c0_9 = arith.constant 0 : index
    %10 = vector.load %arg4[%c0_7, %c0_8, %c0_9] : memref<1x2x128xf32, #tpu.memory_space<vmem>>, vector<1x2x128xf32>
    %11 = vector.shape_cast %10 : vector<1x2x128xf32> to vector<2x128xf32>
    %12 = vector.shape_cast %9 : vector<2x128xf32> to vector<1x2x128xf32>
    tpu.vector_store %arg4[%c0_7, %c0_8, %c0_9], %12 {strides = array<i32>} : memref<1x2x128xf32, #tpu.memory_space<vmem>>, vector<1x2x128xf32>,
    return
  }
  func.func @transform_0(%arg0: i32) -> (i32, i32) {
    %c0_i32 = arith.constant 0 : i32
    %c0_i32_0 = arith.constant 0 : i32
    return %arg0, %c0_i32 : i32, i32
  }
  func.func @transform_1(%arg0: i32) -> (i32, i32) {
    %c0_i32 = arith.constant 0 : i32
    %c0_i32_0 = arith.constant 0 : i32
    %c0_i32_1 = arith.constant 0 : i32
    return %c0_i32, %c0_i32_0 : i32, i32
  }
  func.func @transform_2(%arg0: i32) -> (i32, i32) {
    %c0_i32 = arith.constant 0 : i32
    %c0_i32_0 = arith.constant 0 : i32
    return %arg0, %c0_i32 : i32, i32
  }
  func.func @transform_3(%arg0: i32) -> (i32, i32, i32) {
    %c0_i32 = arith.constant 0 : i32
    %c0_i32_0 = arith.constant 0 : i32
    %c0_i32_1 = arith.constant 0 : i32
    return %arg0, %c0_i32, %c0_i32_0 : i32, i32, i32
  }
}

</mosaic_0001>

<bundles_post_ra>
// kernel: tpu_custom_call.1
= control target key start
LH: loop header
LB: loop body
LE: loop exit
PB: predicated region body
PF: predicated region fallthrough
CT: control target
= control target key end

     0   :  { %9 = vsyncpa [#allocation3], 0  ;;  %vm117_vm0 = vcmask 1041408   ;;  %s487_s0 = inlined_call_operand.vmem [shape: bf16[128,36], index: 0, kind: input, shape index: {}]   ;;  %s488_s1 = inlined_call_operand.vmem [shape: bf16[36,128], index: 1, kind: input, shape index: {}]   ;;  %s489_s2 = inlined_call_operand.hbm [shape: f32[128,128], index: 2, kind: output, shape index: {0}]   ;;  %s490_s3 = inlined_call_operand.hbm [shape: f32[1,2,128], index: 3, kind: output, shape index: {1}]  }
   0x1   :  { %v36_v0 = vld [vmem:[%s488_s1 + $0x10] sm:$0x3] }
   0x2   :  { %v86_v1 = vunpack.c.l.b16 %v36_v0 }
   0x4   :  { %v89_v2 = vpack.c.b16 %v86_v1, %v86_v1 }
   0x5   :  { %10 = vsyncpa [#allocation5], 0  ;;  %v338_v4 = vld [vmem:[%s488_s1 + $0x8] sm:$0xff]  ;;  %v337_v5 = vld [vmem:[%s488_s1] sm:$0xff]  ;;  %vm92_vm1 = vcmask 293888   ;;  %s253_s9 = sshll.u32 %s489_s2, 4  ;;  %s254_s9 = int_to_ptr.hbm [resolvable:$true] %s253_s9 }
   0x6   :  { %v119_v3 = vsel %vm117_vm0, %v89_v2, 0  ;;  %v329_v6 = vld [vmem:[%s487_s0] sm:$0xff]  ;;  %v331_v7 = vld [vmem:[%s487_s0 + $0x10] sm:$0xff]  ;;  %v330_v10 = vld [vmem:[%s487_s0 + $0x8] sm:$0xff]  ;;  %s405_s10 = smov 128   ;;  %s406_s11 = smov 8  }
   0x7   :  { %126 = vmatpush.bf16.msra.mxu0 %v119_v3  ;;  %339 = vmatpush.bf16.msra.mxu1 %v119_v3  ;;  %v333_v8 = vld [vmem:[%s487_s0 + $0x20] sm:$0xff]  ;;  %v335_v9 = vld [vmem:[%s487_s0 + $0x30] sm:$0xff]  ;;  %v332_v11 = vld [vmem:[%s487_s0 + $0x18] sm:$0xff]  ;;  %s407_s2 = smov [#allocation4]   ;;  %s267_s15 = sshll.u32 %s490_s3, 4  ;;  %vm244_vm2 = vcmask 1040384   ;;  %s268_s15 = int_to_ptr.hbm [resolvable:$true] %s267_s15 }
   0x8   :  { %340 = vmatpush.bf16.msra.mxu2 %v119_v3  ;;  %341 = vmatpush.bf16.msra.mxu3 %v119_v3  ;;  %v334_v12 = vld [vmem:[%s487_s0 + $0x28] sm:$0xff]  ;;  %v336_v13 = vld [vmem:[%s487_s0 + $0x38] sm:$0xff]  ;;  %s404_s0 = smov [#allocation2]   ;;  %s265_s12 = sshll.u32 %s407_s2, 4  ;;  %s266_s12 = int_to_ptr.vmem [resolvable:$true] %s265_s12 }
   0x9   :  { %s251_s6 = sshll.u32 %s404_s0, 4  ;;  %s252_s6 = int_to_ptr.vmem [resolvable:$true] %s251_s6 }
   0xb   :  { %127 = vmatpush.bf16.msra.mxu0 %v338_v4  ;;  %342 = vmatpush.bf16.msra.mxu1 %v338_v4 }
   0xc   :  { %343 = vmatpush.bf16.msra.mxu2 %v338_v4  ;;  %344 = vmatpush.bf16.msra.mxu3 %v338_v4 }
   0xf   :  { %128 = vmatpush.bf16.msra.mxu0 %v337_v5  ;;  %345 = vmatpush.bf16.msra.mxu1 %v337_v5 }
  0x10   :  { %346 = vmatpush.bf16.msra.mxu2 %v337_v5  ;;  %347 = vmatpush.bf16.msra.mxu3 %v337_v5 }
  0x12   :  { %321 = vmatmul.msk.bf16.vlgmr.msra.gmra.mxu0 %vm92_vm1, %v329_v6  ;;  %323 = vmatmul.msk.bf16.vlgmr.msra.gmra.mxu1 %vm92_vm1, %v331_v7 }
  0x13   :  { %325 = vmatmul.msk.bf16.vlgmr.msra.gmra.mxu2 %vm92_vm1, %v333_v8  ;;  %327 = vmatmul.msk.bf16.vlgmr.msra.gmra.mxu3 %vm92_vm1, %v335_v9 }
  0x22   :  { %322 = vmatmul.msk.bf16.gmra.mxu0 %vm92_vm1, %v330_v10  ;;  %324 = vmatmul.msk.bf16.gmra.mxu1 %vm92_vm1, %v332_v11 }
  0x23   :  { %326 = vmatmul.msk.bf16.gmra.mxu2 %vm92_vm1, %v334_v12  ;;  %328 = vmatmul.msk.bf16.gmra.mxu3 %vm92_vm1, %v336_v13 }
  0x8f   :  { %v130_v14 = vpop.f32.mrf.mxu0  ;;  %v140_v15 = vpop.f32.mrf.mxu1 }
  0x90   :  { %170 = vst [vmem:[#allocation2] sm:$0xff] %v130_v14  ;;  %v207_v25 = vmul.f32 %v130_v14, %v130_v14  ;;  %v211_v37 = vmul.f32 %v140_v15, %v140_v15 }
  0x91   :  { %174 = vst [vmem:[#allocation2 + $0x20] sm:$0xff] %v140_v15 }
  0x96   :  { %v150_v16 = vpop.f32.mrf.mxu2  ;;  %v469_v17 = vpop.f32.mrf.mxu3 }
  0x97   :  { %v132_v18 = vpop.f32.mrf.mxu0  ;;  %v142_v19 = vpop.f32.mrf.mxu1  ;;  %178 = vst [vmem:[#allocation2 + $0x40] sm:$0xff] %v150_v16  ;;  %v215_v51 = vmul.f32 %v150_v16, %v150_v16  ;;  %v219_v63 = vmul.f32 %v469_v17, %v469_v17 }
  0x98   :  { %171 = vst [vmem:[#allocation2 + $0x8] sm:$0xff] %v132_v18  ;;  %v208_v24 = vmul.f32 %v132_v18, %v132_v18  ;;  %v186_v26 = vadd.f32 %v132_v18, %v130_v14  ;;  %v212_v40 = vmul.f32 %v142_v19, %v142_v19 }
  0x99   :  { %175 = vst [vmem:[#allocation2 + $0x28] sm:$0xff] %v142_v19 }
  0x9a   :  { %182 = vst [vmem:[#allocation2 + $0x60] sm:$0xff] %v469_v17  ;;  %v223_v28 = vadd.f32 %v208_v24, %v207_v25 }
  0x9e   :  { %v152_v20 = vpop.f32.mrf.mxu2  ;;  %v472_v21 = vpop.f32.mrf.mxu3 }
  0x9f   :  { %v135_v22 = vpop.f32.mrf.mxu0  ;;  %v145_v23 = vpop.f32.mrf.mxu1  ;;  %179 = vst [vmem:[#allocation2 + $0x48] sm:$0xff] %v152_v20  ;;  %v216_v54 = vmul.f32 %v152_v20, %v152_v20  ;;  %v220_v2 = vmul.f32 %v472_v21, %v472_v21 }
  0xa0   :  { %172 = vst [vmem:[#allocation2 + $0x10] sm:$0xff] %v135_v22  ;;  %v209_v27 = vmul.f32 %v135_v22, %v135_v22  ;;  %v187_v29 = vadd.f32 %v186_v26, %v135_v22  ;;  %v213_v43 = vmul.f32 %v145_v23, %v145_v23 }
  0xa1   :  { %176 = vst [vmem:[#allocation2 + $0x30] sm:$0xff] %v145_v23 }
  0xa2   :  { %183 = vst [vmem:[#allocation2 + $0x68] sm:$0xff] %v472_v21  ;;  %v224_v34 = vadd.f32 %v223_v28, %v209_v27 }
  0xa6   :  { %v155_v30 = vpop.f32.mrf.mxu2  ;;  %v165_v31 = vpop.f32.mrf.mxu3 }
  0xa7   :  { %v137_v32 = vpop.f32.mrf.mxu0  ;;  %v147_v33 = vpop.f32.mrf.mxu1  ;;  %180 = vst [vmem:[#allocation2 + $0x50] sm:$0xff] %v155_v30  ;;  %v217_v58 = vmul.f32 %v155_v30, %v155_v30  ;;  %v221_v6 = vmul.f32 %v165_v31, %v165_v31 }
  0xa8   :  { %173 = vst [vmem:[#allocation2 + $0x18] sm:$0xff] %v137_v32  ;;  %v188_v35 = vadd.f32 %v187_v29, %v137_v32  ;;  %v210_v36 = vmul.f32 %v137_v32, %v137_v32  ;;  %v214_v49 = vmul.f32 %v147_v33, %v147_v33 }
  0xa9   :  { %177 = vst [vmem:[#allocation2 + $0x38] sm:$0xff] %v147_v33 }
  0xaa   :  { %v189_v38 = vadd.f32 %v188_v35, %v140_v15  ;;  %v225_v39 = vadd.f32 %v224_v34, %v210_v36  ;;  %184 = vst [vmem:[#allocation2 + $0x70] sm:$0xff] %v165_v31 }
  0xac   :  { %v226_v41 = vadd.f32 %v225_v39, %v211_v37  ;;  %v190_v42 = vadd.f32 %v189_v38, %v142_v19 }
  0xae   :  { %v191_v44 = vadd.f32 %v190_v42, %v145_v23  ;;  %v227_v45 = vadd.f32 %v226_v41, %v212_v40  ;;  %v157_v46 = vpop.f32.mrf.mxu2  ;;  %v167_v47 = vpop.f32.mrf.mxu3 }
  0xaf   :  { %181 = vst [vmem:[#allocation2 + $0x58] sm:$0xff] %v157_v46  ;;  %v218_v62 = vmul.f32 %v157_v46, %v157_v46  ;;  %v222_v10 = vmul.f32 %v167_v47, %v167_v47 }
  0xb0   :  { %v192_v48 = vadd.f32 %v191_v44, %v147_v33  ;;  %v228_v50 = vadd.f32 %v227_v45, %v213_v43  ;;  %185 = vst [vmem:[#allocation2 + $0x78] sm:$0xff] %v167_v47 }
  0xb1   :  { %259 = dma.vmem_to_hbm [thread:$0]  %s252_s6, 2048, %s254_s9, [#allocation3], %s405_s10, %s405_s10, %s406_s11  }
  0xb2   :  { %v193_v52 = vadd.f32 %v192_v48, %v150_v16  ;;  %v229_v53 = vadd.f32 %v228_v50, %v214_v49 }
  0xb4   :  { %v230_v55 = vadd.f32 %v229_v53, %v215_v51  ;;  %v194_v56 = vadd.f32 %v193_v52, %v152_v20 }
  0xb6   :  { %v195_v57 = vadd.f32 %v194_v56, %v155_v30  ;;  %v231_v59 = vadd.f32 %v230_v55, %v216_v54 }
  0xb8   :  { %v232_v60 = vadd.f32 %v231_v59, %v217_v58  ;;  %v196_v61 = vadd.f32 %v195_v57, %v157_v46 }
  0xba   :  { %v197_v0 = vadd.f32 %v196_v61, %v469_v17  ;;  %v233_v1 = vadd.f32 %v232_v60, %v218_v62 }
  0xbc   :  { %v234_v3 = vadd.f32 %v233_v1, %v219_v63  ;;  %v198_v4 = vadd.f32 %v197_v0, %v472_v21 }
  0xbe   :  { %v199_v5 = vadd.f32 %v198_v4, %v165_v31  ;;  %v235_v7 = vadd.f32 %v234_v3, %v220_v2 }
  0xc0   :  { %v236_v8 = vadd.f32 %v235_v7, %v221_v6  ;;  %v200_v9 = vadd.f32 %v199_v5, %v167_v47 }
  0xc2   :  { %v201_v11 = vrot.slane %v200_v9, 4  ;;  %v237_v12 = vadd.f32 %v236_v8, %v222_v10 }
  0xc4   :  { %v202_v13 = vadd.f32 %v201_v11, %v200_v9  ;;  %v238_v14 = vrot.slane %v237_v12, 4 }
  0xc6   :  { %v203_v15 = vrot.slane %v202_v13, 2  ;;  %v239_v16 = vadd.f32 %v238_v14, %v237_v12 }
  0xc8   :  { %v204_v17 = vadd.f32 %v203_v15, %v202_v13  ;;  %v240_v18 = vrot.slane %v239_v16, 2 }
  0xca   :  { %v205_v19 = vrot.slane %v204_v17, 1  ;;  %v241_v20 = vadd.f32 %v240_v18, %v239_v16 }
  0xcc   :  { %v242_v22 = vrot.slane %v241_v20, 1  ;;  %v206_v21 = vadd.f32 %v205_v19, %v204_v17 }
  0xce   :  { %v243_v23 = vadd.f32 %v242_v22, %v241_v20 }
  0xd0   :  { %v245_v24 = vsel %vm244_vm2, %v206_v21, %v243_v23 }
  0xd1   :  { %246 = vst [vmem:[#allocation4] sm:$0x3] %v245_v24 }
  0xd2   :  { %270 = dma.vmem_to_hbm [thread:$0]  %s266_s12, 32, %s268_s15, [#allocation5]  }
  0xd3   :  { %400 = dma.done.wait [#allocation3], 2048  }
  0xd4   :  { %401 = vsyncadd [#allocation3], 4294965248 }
  0xd5   :  { %402 = dma.done.wait [#allocation5], 32  }
  0xd6   :  { %403 = vsyncadd [#allocation5], 4294967264 }
  0xd7   :  { %279 = vsyncpa [#allocation3], 1 }
  0xd8   :  { %280 = vsyncpa [#allocation5], 1 }

</bundles_post_ra>
